<compile_context>
chip_gen: v7x
topology: tpu7x:2x2x1
jax: 0.10.0
libtpu: 0.0.40
codegen_flags: <defaults>
</compile_context>

<pallas_src>
import functools

import jax
import jax.numpy as jnp
from jax.experimental import pallas as pl
from jax.experimental.pallas import tpu as pltpu


def _film_kernel(g1_ref, b_ref, x_ref, ln_g_ref, ln_b_ref, o_ref,
                 *, use_layer_norm, eps, inv_f):
    """FiLM modulation (+ optional LayerNorm) on one tile.

    g1_ref   : (bt, 1, F)   per-batch (1 + gamma), precomputed in the wrapper
    b_ref    : (bt, 1, F)   per-batch beta
    x_ref    : (bt, tt, F)  features to modulate
    ln_g_ref : (1, 1, F)    layernorm scale
    ln_b_ref : (1, 1, F)    layernorm shift
    o_ref    : (bt, tt, F)  output
    """
    x = x_ref[...]                              # (bt, tt, F), native dtype
    gamma1 = g1_ref[...]                        # (bt, 1, F)
    beta = b_ref[...]                           # (bt, 1, F)

    out = gamma1 * x + beta                     # VPU elementwise, broadcast over T

    if use_layer_norm:
        # Fused statistics: one pass producing sum and sum-of-squares.
        out32 = out.astype(jnp.float32)
        s = jnp.sum(out32, axis=-1, keepdims=True)            # (bt, tt, 1)
        ss = jnp.sum(out32 * out32, axis=-1, keepdims=True)   # (bt, tt, 1)
        mean = s * inv_f
        var = jnp.maximum(ss * inv_f - mean * mean, 0.0)
        inv = jax.lax.rsqrt(var + eps)                         # EUP
        out = (out32 - mean) * inv * ln_g_ref[...] + ln_b_ref[...]

    o_ref[...] = out.astype(o_ref.dtype)


def _choose_tiles(B, T, F, itemsize, budget_bytes=8 << 20):
    """Pick (bt, tt) so ~4 double-buffered (bt, tt, F) blocks fit the budget.

    8 MiB of block traffic stays well under the scoped-VMEM defaults on
    v5e (16 MiB) / v6e (32 MiB) and leaves large headroom on v7x (64 MiB VMEM).
    tt is either the full sequence or a multiple-of-8 divisor of T (so the
    BlockSpec (8, 128) sublane rule is always satisfied without padded reads
    feeding the LN statistics).
    """
    def fits(bt, tt):
        return 4 * bt * tt * F * itemsize <= budget_bytes

    # Sequence tile.
    if fits(1, T):
        tt = T
    else:
        tt = None
        for d in range(8, T, 8):
            if T % d == 0 and fits(1, d):
                tt = d
        if tt is None:
            tt = T  # fall back to whole sequence; vmem_limit_bytes is raised.

    # Fold batch rows only when a step already covers the full sequence
    # (keeps per-step tiles fat when T*F is small).
    bt = 1
    if tt == T:
        for d in range(1, B + 1):
            if B % d == 0 and fits(d, T):
                bt = d
    return bt, tt


def film_forward(x_cond, x_to_film, w, b, ln_gamma, ln_beta,
                 *, use_layer_norm=True, eps=1e-5):
    """Pallas FiLM forward.

    x_cond    : (B, D_in)
    x_to_film : (B, T, F)
    w         : (D_in, 2*F)   (nn.Linear weight, pre-transposed)
    b         : (2*F,)
    ln_gamma  : (F,)
    ln_beta   : (F,)
    returns   : (B, T, F)
    """
    B, D_in = x_cond.shape
    Bx, T, F = x_to_film.shape
    assert Bx == B and w.shape == (D_in, 2 * F)

    # Hoisted projection: one batched GEMM for the whole batch, split into
    # (1 + gamma) / beta outside the kernel (no mid-vreg lane slice in Pallas,
    # and the "+1" broadcast-add is done once here instead of per tile).
    gb = (x_cond.astype(jnp.float32) @ w.astype(jnp.float32)
          + b.astype(jnp.float32))                       # (B, 2F)
    gamma1 = (1.0 + gb[:, :F]).astype(x_to_film.dtype).reshape(B, 1, F)
    beta = gb[:, F:].astype(x_to_film.dtype).reshape(B, 1, F)

    ln_g3 = ln_gamma.astype(jnp.float32).reshape(1, 1, F)
    ln_b3 = ln_beta.astype(jnp.float32).reshape(1, 1, F)

    bt, tt = _choose_tiles(B, T, F, x_to_film.dtype.itemsize)
    grid = (B // bt, pl.cdiv(T, tt))

    # Double-buffered in + out blocks plus small per-batch / LN params.
    block_bytes = 4 * bt * tt * F * x_to_film.dtype.itemsize
    vmem_limit = max(32 * 1024 * 1024, int(block_bytes * 1.5))

    kernel = functools.partial(
        _film_kernel, use_layer_norm=use_layer_norm, eps=eps, inv_f=1.0 / F)

    return pl.pallas_call(
        kernel,
        out_shape=jax.ShapeDtypeStruct((B, T, F), x_to_film.dtype),
        grid_spec=pltpu.PrefetchScalarGridSpec(
            num_scalar_prefetch=0,
            grid=grid,
            in_specs=[
                pl.BlockSpec((bt, 1, F), lambda i, j: (i, 0, 0)),    # 1+gamma
                pl.BlockSpec((bt, 1, F), lambda i, j: (i, 0, 0)),    # beta
                pl.BlockSpec((bt, tt, F), lambda i, j: (i, j, 0)),   # x_to_film
                pl.BlockSpec((1, 1, F), lambda i, j: (0, 0, 0)),     # ln gamma
                pl.BlockSpec((1, 1, F), lambda i, j: (0, 0, 0)),     # ln beta
            ],
            out_specs=pl.BlockSpec((bt, tt, F), lambda i, j: (i, j, 0)),
        ),
        compiler_params=pltpu.CompilerParams(
            dimension_semantics=("parallel", "parallel"),
            vmem_limit_bytes=vmem_limit,
        ),
    )(gamma1, beta, x_to_film, ln_g3, ln_b3)


def film_reference(x_cond, x_to_film, w, b, ln_gamma, ln_beta,
                   *, use_layer_norm=True, eps=1e-5):
    """Plain-JAX reference matching the PyTorch module."""
    gb = x_cond @ w + b                      # (B, 2F)
    gb = gb[:, None, :]                      # unsqueeze(1)
    F = x_to_film.shape[-1]
    gamma, beta = gb[..., :F], gb[..., F:]
    out = (1.0 + gamma) * x_to_film + beta
    if use_layer_norm:
        mean = jnp.mean(out, axis=-1, keepdims=True)
        var = jnp.mean((out - mean) ** 2, axis=-1, keepdims=True)
        out = (out - mean) * jax.lax.rsqrt(var + eps) * ln_gamma + ln_beta
    return out


if __name__ == "__main__":
    # Small, deterministic shapes: batch=2, seq=8, input_size=32, output_size=32.
    B, T = 2, 8
    input_size, output_size = 32, 32

    key = jax.random.PRNGKey(0)
    k_xc, k_xf, k_w, k_lg, k_lb = jax.random.split(key, 5)

    x_cond = jax.random.normal(k_xc, (B, input_size), dtype=jnp.float32)
    x_to_film = jax.random.normal(k_xf, (B, T, output_size), dtype=jnp.float32)

    # nn.Linear(input_size, 2*output_size): weight ~ U(-1/sqrt(D_in), 1/sqrt(D_in)),
    # stored pre-transposed as (D_in, 2*F); bias filled with 0 in __init__.
    bound = 1.0 / (input_size ** 0.5)
    w = jax.random.uniform(k_w, (input_size, 2 * output_size),
                           minval=-bound, maxval=bound, dtype=jnp.float32)
    b = jnp.zeros((2 * output_size,), dtype=jnp.float32)

    # LayerNorm affine params (non-trivial values to exercise the affine path).
    ln_gamma = 1.0 + 0.1 * jax.random.normal(k_lg, (output_size,), dtype=jnp.float32)
    ln_beta = 0.1 * jax.random.normal(k_lb, (output_size,), dtype=jnp.float32)

    for layer_norm in (True, False):
        out = film_forward(x_cond, x_to_film, w, b, ln_gamma, ln_beta,
                           use_layer_norm=layer_norm)
        out = jax.block_until_ready(out)
        ref = film_reference(x_cond, x_to_film, w, b, ln_gamma, ln_beta,
                             use_layer_norm=layer_norm)
        assert out.shape == (B, T, output_size)
        assert jnp.allclose(out, ref, atol=3e-5, rtol=3e-5), \
            f"mismatch vs reference (layer_norm={layer_norm})"

    print("KERNEL_OK")
</pallas_src>

<mosaic_0001>
module attributes {stable_mosaic.version = 11 : i64} {
  func.func @_film_kernel(%arg0: i32, %arg1: i32, %arg2: memref<2x1x32xf32, #tpu.memory_space<vmem>>, %arg3: memref<2x1x32xf32, #tpu.memory_space<vmem>>, %arg4: memref<2x8x32xf32, #tpu.memory_space<vmem>>, %arg5: memref<1x1x32xf32, #tpu.memory_space<vmem>>, %arg6: memref<1x1x32xf32, #tpu.memory_space<vmem>>, %arg7: memref<2x8x32xf32, #tpu.memory_space<vmem>>) attributes {dimension_semantics = [#tpu.dimension_semantics<parallel>, #tpu.dimension_semantics<parallel>], iteration_bounds = array<i64: 1, 1>, scalar_prefetch = 0 : i64, scratch_operands = 0 : i64, tpu.core_type = #tpu.core_type<tc>, window_params = [{transform_indices = @transform_0, window_bounds = array<i64: 2, 1, 32>}, {transform_indices = @transform_1, window_bounds = array<i64: 2, 1, 32>}, {transform_indices = @transform_2, window_bounds = array<i64: 2, 8, 32>}, {pipeline_mode = #tpu.pipeline_mode<synchronous>, transform_indices = @transform_3, window_bounds = array<i64: 1, 1, 32>}, {pipeline_mode = #tpu.pipeline_mode<synchronous>, transform_indices = @transform_4, window_bounds = array<i64: 1, 1, 32>}, {transform_indices = @transform_5, window_bounds = array<i64: 2, 8, 32>}]} {
    %c0 = arith.constant 0 : index
    %c0_0 = arith.constant 0 : index
    %c0_1 = arith.constant 0 : index
    %0 = vector.load %arg4[%c0, %c0_0, %c0_1] : memref<2x8x32xf32, #tpu.memory_space<vmem>>, vector<2x8x32xf32>
    %c0_2 = arith.constant 0 : index
    %c0_3 = arith.constant 0 : index
    %c0_4 = arith.constant 0 : index
    %1 = vector.load %arg2[%c0_2, %c0_3, %c0_4] : memref<2x1x32xf32, #tpu.memory_space<vmem>>, vector<2x1x32xf32>
    %c0_5 = arith.constant 0 : index
    %c0_6 = arith.constant 0 : index
    %c0_7 = arith.constant 0 : index
    %2 = vector.load %arg3[%c0_5, %c0_6, %c0_7] : memref<2x1x32xf32, #tpu.memory_space<vmem>>, vector<2x1x32xf32>
    %3 = vector.broadcast %1 : vector<2x1x32xf32> to vector<2x8x32xf32>
    %4 = arith.mulf %3, %0 : vector<2x8x32xf32>
    %5 = vector.broadcast %2 : vector<2x1x32xf32> to vector<2x8x32xf32>
    %6 = arith.addf %4, %5 : vector<2x8x32xf32>
    %cst = arith.constant dense<0.000000e+00> : vector<2x8xf32>
    %7 = vector.multi_reduction <add>, %6, %cst [2] : vector<2x8x32xf32> to vector<2x8xf32>
    %8 = vector.shape_cast %7 : vector<2x8xf32> to vector<2x8x1xf32>
    %9 = arith.mulf %6, %6 : vector<2x8x32xf32>
    %cst_8 = arith.constant dense<0.000000e+00> : vector<2x8xf32>
    %10 = vector.multi_reduction <add>, %9, %cst_8 [2] : vector<2x8x32xf32> to vector<2x8xf32>
    %11 = vector.shape_cast %10 : vector<2x8xf32> to vector<2x8x1xf32>
    %cst_9 = arith.constant 3.125000e-02 : f32
    %12 = vector.broadcast %cst_9 : f32 to vector<2x8x1xf32>
    %13 = arith.mulf %8, %12 : vector<2x8x1xf32>
    %cst_10 = arith.constant 3.125000e-02 : f32
    %14 = vector.broadcast %cst_10 : f32 to vector<2x8x1xf32>
    %15 = arith.mulf %11, %14 : vector<2x8x1xf32>
    %16 = arith.mulf %13, %13 : vector<2x8x1xf32>
    %17 = arith.subf %15, %16 : vector<2x8x1xf32>
    %cst_11 = arith.constant 0.000000e+00 : f32
    %18 = vector.broadcast %cst_11 : f32 to vector<2x8x1xf32>
    %19 = arith.maximumf %17, %18 : vector<2x8x1xf32>
    %cst_12 = arith.constant 9.99999974E-6 : f32
    %20 = vector.broadcast %cst_12 : f32 to vector<2x8x1xf32>
    %21 = arith.addf %19, %20 : vector<2x8x1xf32>
    %22 = math.rsqrt %21 : vector<2x8x1xf32>
    %23 = vector.broadcast %13 : vector<2x8x1xf32> to vector<2x8x32xf32>
    %24 = arith.subf %6, %23 : vector<2x8x32xf32>
    %25 = vector.broadcast %22 : vector<2x8x1xf32> to vector<2x8x32xf32>
    %26 = arith.mulf %24, %25 : vector<2x8x32xf32>
    %c0_13 = arith.constant 0 : index
    %c0_14 = arith.constant 0 : index
    %c0_15 = arith.constant 0 : index
    %27 = vector.load %arg5[%c0_13, %c0_14, %c0_15] : memref<1x1x32xf32, #tpu.memory_space<vmem>>, vector<1x1x32xf32>
    %28 = vector.broadcast %27 : vector<1x1x32xf32> to vector<2x8x32xf32>
    %29 = arith.mulf %26, %28 : vector<2x8x32xf32>
    %c0_16 = arith.constant 0 : index
    %c0_17 = arith.constant 0 : index
    %c0_18 = arith.constant 0 : index
    %30 = vector.load %arg6[%c0_16, %c0_17, %c0_18] : memref<1x1x32xf32, #tpu.memory_space<vmem>>, vector<1x1x32xf32>
    %31 = vector.broadcast %30 : vector<1x1x32xf32> to vector<2x8x32xf32>
    %32 = arith.addf %29, %31 : vector<2x8x32xf32>
    %c0_19 = arith.constant 0 : index
    %c0_20 = arith.constant 0 : index
    %c0_21 = arith.constant 0 : index
    %33 = vector.load %arg7[%c0_19, %c0_20, %c0_21] : memref<2x8x32xf32, #tpu.memory_space<vmem>>, vector<2x8x32xf32>
    tpu.vector_store %arg7[%c0_19, %c0_20, %c0_21], %32 {strides = array<i32>} : memref<2x8x32xf32, #tpu.memory_space<vmem>>, vector<2x8x32xf32>,
    return
  }
  func.func @transform_0(%arg0: i32, %arg1: i32) -> (i32, i32, i32) {
    %c0_i32 = arith.constant 0 : i32
    %c0_i32_0 = arith.constant 0 : i32
    %c0_i32_1 = arith.constant 0 : i32
    return %arg0, %c0_i32, %c0_i32_0 : i32, i32, i32
  }
  func.func @transform_1(%arg0: i32, %arg1: i32) -> (i32, i32, i32) {
    %c0_i32 = arith.constant 0 : i32
    %c0_i32_0 = arith.constant 0 : i32
    %c0_i32_1 = arith.constant 0 : i32
    return %arg0, %c0_i32, %c0_i32_0 : i32, i32, i32
  }
  func.func @transform_2(%arg0: i32, %arg1: i32) -> (i32, i32, i32) {
    %c0_i32 = arith.constant 0 : i32
    %c0_i32_0 = arith.constant 0 : i32
    return %arg0, %arg1, %c0_i32 : i32, i32, i32
  }
  func.func @transform_3(%arg0: i32, %arg1: i32) -> (i32, i32, i32) {
    %c0_i32 = arith.constant 0 : i32
    %c0_i32_0 = arith.constant 0 : i32
    %c0_i32_1 = arith.constant 0 : i32
    %c0_i32_2 = arith.constant 0 : i32
    return %c0_i32, %c0_i32_0, %c0_i32_1 : i32, i32, i32
  }
  func.func @transform_4(%arg0: i32, %arg1: i32) -> (i32, i32, i32) {
    %c0_i32 = arith.constant 0 : i32
    %c0_i32_0 = arith.constant 0 : i32
    %c0_i32_1 = arith.constant 0 : i32
    %c0_i32_2 = arith.constant 0 : i32
    return %c0_i32, %c0_i32_0, %c0_i32_1 : i32, i32, i32
  }
  func.func @transform_5(%arg0: i32, %arg1: i32) -> (i32, i32, i32) {
    %c0_i32 = arith.constant 0 : i32
    %c0_i32_0 = arith.constant 0 : i32
    return %arg0, %arg1, %c0_i32 : i32, i32, i32
  }
}

</mosaic_0001>

<bundles_post_ra>
// kernel: tpu_custom_call.1
= control target key start
LH: loop header
LB: loop body
LE: loop exit
PB: predicated region body
PF: predicated region fallthrough
CT: control target
= control target key end

     0   :  { %10 = vsyncpa [#allocation3], 0  ;;  %s340_s0 = inlined_call_operand.hbm [shape: f32[2,1,32], index: 0, kind: input, shape index: {}]   ;;  %s341_s1 = inlined_call_operand.vmem [shape: f32[2,1,32], index: 1, kind: input, shape index: {}]   ;;  %s342_s2 = inlined_call_operand.hbm [shape: f32[2,8,32], index: 2, kind: input, shape index: {}]   ;;  %s343_s3 = inlined_call_operand.vmem [shape: f32[1,1,32], index: 3, kind: input, shape index: {}]   ;;  %s344_s4 = inlined_call_operand.vmem [shape: f32[1,1,32], index: 4, kind: input, shape index: {}]   ;;  %s345_s5 = inlined_call_operand.hbm [shape: f32[2,8,32], index: 5, kind: output, shape index: {}]  }
   0x1   :  { %11 = vsyncpa [#allocation6], 0 }
   0x2   :  { %12 = vsyncpa [#allocation4], 0  ;;  %s243_s18 = smov [#allocation2]   ;;  %s171_s22 = scalar_lea.hbm %s340_s0, 32 }
   0x3   :  { %s18_s19 = sshll.u32 %s243_s18, 4  ;;  %p172_p0 = scmp.ne.s32.totalorder %s340_s0, %s171_s22  ;;  %s19_s19 = int_to_ptr.vmem [resolvable:$true] %s18_s19 }
   0x4   :  { %p175_p1 = scmp.lt.u32.totalorder %s171_s22, %s340_s0 }
   0x6   :  { %p177_p2 = pnand %p175_p1, %p172_p0 }
   0x8   :  { %180 = shalt.err (!%p177_p2)
}
   0x9   :  { %s181_s27 = scalar_lea.vmem %s19_s19, 32  ;;  %p186_p4 = scmp.lt.s32.totalorder %s19_s19, %s19_s19 }
   0xa   :  { %p182_p3 = scmp.ne.s32.totalorder %s19_s19, %s181_s27  ;;  %p187_p5 = scmp.lt.s32.totalorder %s181_s27, %s181_s27 }
   0xc   :  { %p188_p6 = por %p187_p5, %p186_p4 }
   0xe   :  { %p189_p7 = pnand %p188_p6, %p182_p3 }
  0x10   :  { %192 = shalt.err (!%p189_p7)
}
  0x11   :  { %s244_s28 = smov 16   ;;  %s245_s29 = smov 1  }
  0x12   :  { %24 = dma.hbm_to_vmem [thread:$0]  %s340_s0, 32, %s19_s19, [#allocation3], %s244_s28, %s244_s28, %s245_s29  }
  0x13   :  { %s246_s7 = smov [#allocation5]   ;;  %s193_s11 = scalar_lea.hbm %s342_s2, 256 }
  0x14   :  { %s32_s8 = sshll.u32 %s246_s7, 4  ;;  %p194_p8 = scmp.ne.s32.totalorder %s342_s2, %s193_s11  ;;  %s33_s8 = int_to_ptr.vmem [resolvable:$true] %s32_s8 }
  0x15   :  { %p197_p9 = scmp.lt.u32.totalorder %s193_s11, %s342_s2 }
  0x17   :  { %p199_p10 = pnand %p197_p9, %p194_p8 }
  0x19   :  { %202 = shalt.err (!%p199_p10)
}
  0x1a   :  { %s203_s16 = scalar_lea.vmem %s33_s8, 256  ;;  %p208_p12 = scmp.lt.s32.totalorder %s33_s8, %s33_s8 }
  0x1b   :  { %p204_p11 = scmp.ne.s32.totalorder %s33_s8, %s203_s16  ;;  %p209_p13 = scmp.lt.s32.totalorder %s203_s16, %s203_s16 }
  0x1d   :  { %p210_p0 = por %p209_p13, %p208_p12 }
  0x1f   :  { %p211_p1 = pnand %p210_p0, %p204_p11 }
  0x21   :  { %214 = shalt.err (!%p211_p1)
}
  0x22   :  { %s247_s0 = smov 128   ;;  %s248_s17 = smov 8  }
  0x23   :  { %38 = dma.hbm_to_vmem [thread:$0]  %s342_s2, 256, %s33_s8, [#allocation6], %s247_s0, %s247_s0, %s248_s17  }
  0x24   :  { %237 = dma.done.wait [#allocation3], 32  }
  0x25   :  { %238 = vsyncadd [#allocation3], 4294967264 }
  0x26   :  { %239 = dma.done.wait [#allocation6], 256  }
  0x27   :  { %240 = vsyncadd [#allocation6], 4294967040  ;;  %v49_v0 = vld [vmem:[#allocation5] sm:$0xff]  ;;  %v154_v1 = vld [vmem:[#allocation2] ss:$0 sm:$0xff]  ;;  %vm83_vm0 = vcmask 261120  }
  0x28   :  { %v156_v2 = vld [vmem:[%s341_s1] ss:$0 sm:$0xff]  ;;  %v67_v3 = vmul.f32 %v154_v1, %v49_v0  ;;  %v50_v4 = vld [vmem:[#allocation5 + $0x8] sm:$0xff]  ;;  %v155_v5 = vld [vmem:[#allocation2 + $0x1] ss:$0 sm:$0xff]  ;;  %s249_s26 = smov [#allocation7]  }
  0x29   :  { %v157_v6 = vld [vmem:[%s341_s1 + $0x1] ss:$0 sm:$0xff]  ;;  %v68_v7 = vmul.f32 %v155_v5, %v50_v4  ;;  %v158_v34 = vld [vmem:[%s343_s3] ss:$0 sm:$0xff]  ;;  %s141_s27 = sshll.u32 %s249_s26, 4  ;;  %s142_s27 = int_to_ptr.vmem [resolvable:$true] %s141_s27 }
  0x2a   :  { %v81_v8 = vadd.f32 %v156_v2, %v67_v3  ;;  %v159_v36 = vld [vmem:[%s344_s4] ss:$0 sm:$0xff]  ;;  %s215_s3 = scalar_lea.vmem %s142_s27, 256  ;;  %p220_p3 = scmp.lt.s32.totalorder %s142_s27, %s142_s27 }
  0x2b   :  { %v82_v9 = vadd.f32 %v157_v6, %v68_v7  ;;  %p216_p2 = scmp.ne.s32.totalorder %s142_s27, %s215_s3  ;;  %p221_p4 = scmp.lt.s32.totalorder %s215_s3, %s215_s3 }
  0x2c   :  { %v84_v10 = vsel %vm83_vm0, %v81_v8, 0.0  ;;  %v90_v11 = vmul.f32 %v81_v8, %v81_v8 }
  0x2d   :  { %85 = vadd.xlane.f32.xlu0 %v84_v10  ;;  %v91_v12 = vmul.f32 %v82_v9, %v82_v9  ;;  %v87_v14 = vsel %vm83_vm0, %v82_v9, 0.0  ;;  %p222_p5 = por %p221_p4, %p220_p3 }
  0x2e   :  { %v92_v13 = vsel %vm83_vm0, %v90_v11, 0.0 }
  0x2f   :  { %93 = vadd.xlane.f32.xlu1 %v92_v13  ;;  %v95_v15 = vsel %vm83_vm0, %v91_v12, 0.0  ;;  %p223_p6 = pnand %p222_p5, %p216_p2 }
  0x31   :  { %88 = vadd.xlane.f32.xlu0 %v87_v14 }
  0x33   :  { %96 = vadd.xlane.f32.xlu1 %v95_v15 }
  0xba   :  { %v86_v16 = vpop.xlane.xlu0 %85 }
  0xbb   :  { %v98_v17 = vmul.f32 0.03125, %v86_v16 }
  0xbc   :  { %v94_v18 = vpop.xlane.xlu1 %93 }
  0xbd   :  { %v102_v19 = vmul.f32 %v98_v17, %v98_v17  ;;  %v100_v20 = vmul.f32 0.03125, %v94_v18  ;;  %v112_v32 = vsub.f32 %v81_v8, %v98_v17 }
  0xbe   :  { %v89_v21 = vpop.xlane.xlu0 %88 }
  0xbf   :  { %v104_v22 = vsub.f32 %v100_v20, %v102_v19  ;;  %v99_v23 = vmul.f32 0.03125, %v89_v21 }
  0xc0   :  { %v97_v24 = vpop.xlane.xlu1 %96 }
  0xc1   :  { %v106_v25 = vmax.f32 %v104_v22, 0.0  ;;  %v103_v26 = vmul.f32 %v99_v23, %v99_v23  ;;  %v101_v27 = vmul.f32 0.03125, %v97_v24  ;;  %v113_v37 = vsub.f32 %v82_v9, %v99_v23 }
  0xc3   :  { %v108_v28 = vadd.f32 1e-05, %v106_v25  ;;  %v105_v29 = vsub.f32 %v101_v27, %v103_v26 }
  0xc5   :  { %167 = vrsqrt.f32 %v108_v28  ;;  %v107_v30 = vmax.f32 %v105_v29, 0.0 }
  0xc7   :  { %v109_v31 = vadd.f32 1e-05, %v107_v30 }
  0xc9   :  { %169 = vrsqrt.f32 %v109_v31 }
  0xcf   :  { %v168_v33 = vpop.eup %167 }
  0xd0   :  { %v114_v35 = vmul.f32 %v168_v33, %v112_v32 }
  0xd2   :  { %v123_v38 = vmul.f32 %v158_v34, %v114_v35 }
  0xd3   :  { %v170_v39 = vpop.eup %169 }
  0xd4   :  { %v115_v40 = vmul.f32 %v170_v39, %v113_v37  ;;  %v132_v41 = vadd.f32 %v159_v36, %v123_v38 }
  0xd6   :  { %v124_v42 = vmul.f32 %v158_v34, %v115_v40  ;;  %134 = vst.msk [vmem:[#allocation7] sm:$0xff] %vm83_vm0, %v132_v41 }
  0xd8   :  { %v133_v43 = vadd.f32 %v159_v36, %v124_v42 }
  0xda   :  { %135 = vst.msk [vmem:[#allocation7 + $0x8] sm:$0xff] %vm83_vm0, %v133_v43 }
  0xdb   :  { %226 = shalt.err (!%p223_p6)
}
  0xdc   :  { %s227_s29 = scalar_lea.hbm %s345_s5, 256 }
  0xdd   :  { %p228_p7 = scmp.ne.s32.totalorder %s345_s5, %s227_s29  ;;  %p231_p8 = scmp.lt.u32.totalorder %s227_s29, %s345_s5 }
  0xdf   :  { %p233_p9 = pnand %p231_p8, %p228_p7 }
  0xe1   :  { %236 = shalt.err (!%p233_p9)
}
  0xe2   :  { %147 = dma.vmem_to_hbm [thread:$0]  %s142_s27, 256, %s345_s5, [#allocation4], %s247_s0, %s247_s0, %s248_s17  }
  0xe3   :  { %241 = dma.done.wait [#allocation4], 256  }
  0xe4   :  { %242 = vsyncadd [#allocation4], 4294967040 }
  0xe5   :  { %151 = vsyncpa [#allocation3], 1 }
  0xe6   :  { %152 = vsyncpa [#allocation6], 1 }
  0xe7   :  { %153 = vsyncpa [#allocation4], 1 }

</bundles_post_ra>
